<compile_context>
chip_gen: v7x
topology: tpu7x:2x2x1
jax: 0.10.0
libtpu: 0.0.40
codegen_flags: <defaults>
</compile_context>

<pallas_src>
import jax
import jax.numpy as jnp
from jax.experimental import pallas as pl
from jax.experimental.pallas import tpu as pltpu

H1, H2 = 128, 256  # hidden sizes from the PyTorch module


def _mlp_kernel(x_ref, w1_ref, b1_ref, w2_ref, b2_ref, w3_ref, b3_ref, o_ref):
    # Three MXU matmuls (bf16 inputs, f32 accumulation) + f32 bias add / ReLU on the VPU.
    x = x_ref[...]  # (TB, in) bf16
    h1 = jnp.dot(x, w1_ref[...], preferred_element_type=jnp.float32) + b1_ref[...]
    h1 = jnp.maximum(h1, 0.0).astype(jnp.bfloat16)
    h2 = jnp.dot(h1, w2_ref[...], preferred_element_type=jnp.float32) + b2_ref[...]
    h2 = jnp.maximum(h2, 0.0).astype(jnp.bfloat16)
    out = jnp.dot(h2, w3_ref[...], preferred_element_type=jnp.float32) + b3_ref[...]
    o_ref[...] = out.astype(o_ref.dtype)


def _round_up(n, m):
    return ((n + m - 1) // m) * m


def _pick_tiling(batch, block_batch):
    """Return (tb, n_steps, padded_batch).

    Policy:
      * round batch to bf16 sublane granularity (16) first,
      * derive the step count from the target tile size,
      * force >= 2 grid programs whenever possible so v7x megacore sharding is
        real (harmless on v5e/v6e),
      * pick tb as a near-divisor so we never pad up a full extra tile.
    """
    b16 = _round_up(batch, 16)
    n_steps = max(-(-b16 // block_batch), 1)
    if b16 >= 32:
        n_steps = max(n_steps, 2)          # give the second TC work on v7x
    tb = _round_up(-(-b16 // n_steps), 16)
    n_steps = -(-b16 // tb)
    padded_batch = n_steps * tb
    return tb, n_steps, padded_batch


def target_q_network_forward(x, params, *, block_batch=2048):
    """3-layer MLP forward in one pallas_call, gridded over the batch dimension.

    `params` = (w1, b1, w2, b2, w3, b3); weights are (in, out) (transposed vs
    PyTorch), biases are (1, out). Dtypes are coerced here: bf16 weights, f32 biases.
    """
    w1, b1, w2, b2, w3, b3 = params
    batch, input_size = x.shape
    out_size = w3.shape[1]

    # Enforce the kernel's dtype contract (correctness-review item).
    w1, w2, w3 = (w.astype(jnp.bfloat16) for w in (w1, w2, w3))
    b1, b2, b3 = (b.astype(jnp.float32) for b in (b1, b2, b3))
    x_bf16 = x.astype(jnp.bfloat16)

    tb, n_steps, padded_batch = _pick_tiling(batch, block_batch)
    if padded_batch != batch:
        x_bf16 = jnp.pad(x_bf16, ((0, padded_batch - batch), (0, 0)))

    x_spec = pl.BlockSpec((tb, input_size), lambda i: (i, 0))
    out_spec = pl.BlockSpec((tb, out_size), lambda i: (i, 0))
    # Constant index map + single buffer -> fetched once, resident in VMEM across steps.
    resident = lambda shape: pl.BlockSpec(
        shape, lambda i: (0, 0), pipeline_mode=pl.Buffered(1)
    )

    weight_bytes = (w1.size + w2.size + w3.size) * 2 + (b1.size + b2.size + b3.size) * 4
    cost = pl.CostEstimate(
        flops=2 * padded_batch * (input_size * H1 + H1 * H2 + H2 * out_size),
        transcendentals=0,
        bytes_accessed=padded_batch * input_size * 2
        + padded_batch * out_size * 4
        + weight_bytes,
    )

    # VMEM footprint: double-buffered x/out tiles + f32 h1/h2 temps + resident weights.
    est_vmem = (
        2 * tb * input_size * 2
        + 2 * tb * out_size * 4
        + tb * (H1 + H2) * 4
        + weight_bytes
    )
    vmem_limit = int(min(max(16 * 1024 * 1024, 2 * est_vmem), 48 * 1024 * 1024))

    out_padded = pl.pallas_call(
        _mlp_kernel,
        out_shape=jax.ShapeDtypeStruct((padded_batch, out_size), jnp.float32),
        grid=(n_steps,),
        in_specs=[
            x_spec,
            resident((input_size, H1)),
            resident((1, H1)),
            resident((H1, H2)),
            resident((1, H2)),
            resident((H2, out_size)),
            resident((1, out_size)),
        ],
        out_specs=out_spec,
        compiler_params=pltpu.CompilerParams(
            dimension_semantics=("parallel",),  # megacore sharding on v7x
            vmem_limit_bytes=vmem_limit,
        ),
        cost_estimate=cost,
    )(x_bf16, w1, b1, w2, b2, w3, b3)

    return out_padded[:batch]


def init_params(key, input_size, output_size):
    """PyTorch-Linear-style init; weights stored (in, out) bf16, biases (1, out) f32."""
    sizes = [(input_size, H1), (H1, H2), (H2, output_size)]
    params = []
    for fan_in, fan_out in sizes:
        key, kw, kb = jax.random.split(key, 3)
        bound = 1.0 / jnp.sqrt(jnp.float32(fan_in))
        w = jax.random.uniform(kw, (fan_in, fan_out), jnp.float32, -bound, bound)
        b = jax.random.uniform(kb, (1, fan_out), jnp.float32, -bound, bound)
        params.extend([w.astype(jnp.bfloat16), b])
    return tuple(params)


def reference_forward(x, params):
    """Pure-JAX reference mirroring the kernel numerics (bf16 dot inputs, f32 accumulation)."""
    w1, b1, w2, b2, w3, b3 = params
    w1, w2, w3 = (w.astype(jnp.bfloat16) for w in (w1, w2, w3))
    b1, b2, b3 = (b.astype(jnp.float32) for b in (b1, b2, b3))
    xb = x.astype(jnp.bfloat16)
    h1 = jnp.maximum(jnp.dot(xb, w1, preferred_element_type=jnp.float32) + b1, 0.0)
    h2 = jnp.maximum(
        jnp.dot(h1.astype(jnp.bfloat16), w2, preferred_element_type=jnp.float32) + b2, 0.0
    )
    return jnp.dot(h2.astype(jnp.bfloat16), w3, preferred_element_type=jnp.float32) + b3


if __name__ == "__main__":
    input_size = 32   # flat state vector
    output_size = 8   # discrete actions
    batch = 4

    key = jax.random.PRNGKey(0)
    key, kx = jax.random.split(key)
    x = jax.random.normal(kx, (batch, input_size), jnp.float32)
    params = init_params(key, input_size, output_size)

    out = target_q_network_forward(x, params)
    out = jax.block_until_ready(out)

    ref = reference_forward(x, params)
    assert out.shape == (batch, output_size)
    assert jnp.allclose(out, ref, atol=2e-3, rtol=2e-3), "mismatch vs JAX reference"

    # Exercise the multi-program (megacore-splittable) path with a ragged batch.
    batch2 = 260
    key, kx2 = jax.random.split(key)
    x2 = jax.random.normal(kx2, (batch2, input_size), jnp.float32)
    out2 = jax.block_until_ready(target_q_network_forward(x2, params))
    ref2 = reference_forward(x2, params)
    assert out2.shape == (batch2, output_size)
    assert jnp.allclose(out2, ref2, atol=2e-3, rtol=2e-3), "mismatch vs JAX reference (ragged batch)"

    print("KERNEL_OK")
</pallas_src>

<mosaic_0001>
module attributes {stable_mosaic.version = 11 : i64} {
  func.func @_mlp_kernel(%arg0: i32, %arg1: memref<16x32xbf16, #tpu.memory_space<vmem>>, %arg2: memref<32x128xbf16, #tpu.memory_space<vmem>>, %arg3: memref<1x128xf32, #tpu.memory_space<vmem>>, %arg4: memref<128x256xbf16, #tpu.memory_space<vmem>>, %arg5: memref<1x256xf32, #tpu.memory_space<vmem>>, %arg6: memref<256x8xbf16, #tpu.memory_space<vmem>>, %arg7: memref<1x8xf32, #tpu.memory_space<vmem>>, %arg8: memref<16x8xf32, #tpu.memory_space<vmem>>) attributes {dimension_semantics = [#tpu.dimension_semantics<parallel>], iteration_bounds = array<i64: 1>, scalar_prefetch = 0 : i64, scratch_operands = 0 : i64, tpu.core_type = #tpu.core_type<tc>, window_params = [{transform_indices = @transform_0, window_bounds = array<i64: 16, 32>}, {pipeline_mode = #tpu.pipeline_mode<synchronous>, transform_indices = @transform_1, window_bounds = array<i64: 32, 128>}, {pipeline_mode = #tpu.pipeline_mode<synchronous>, transform_indices = @transform_2, window_bounds = array<i64: 1, 128>}, {pipeline_mode = #tpu.pipeline_mode<synchronous>, transform_indices = @transform_3, window_bounds = array<i64: 128, 256>}, {pipeline_mode = #tpu.pipeline_mode<synchronous>, transform_indices = @transform_4, window_bounds = array<i64: 1, 256>}, {pipeline_mode = #tpu.pipeline_mode<synchronous>, transform_indices = @transform_5, window_bounds = array<i64: 256, 8>}, {pipeline_mode = #tpu.pipeline_mode<synchronous>, transform_indices = @transform_6, window_bounds = array<i64: 1, 8>}, {transform_indices = @transform_7, window_bounds = array<i64: 16, 8>}]} {
    %c0 = arith.constant 0 : index
    %c0_0 = arith.constant 0 : index
    %0 = vector.load %arg1[%c0, %c0_0] : memref<16x32xbf16, #tpu.memory_space<vmem>>, vector<16x32xbf16>
    %c0_1 = arith.constant 0 : index
    %c0_2 = arith.constant 0 : index
    %1 = vector.load %arg2[%c0_1, %c0_2] : memref<32x128xbf16, #tpu.memory_space<vmem>>, vector<32x128xbf16>
    %cst = arith.constant dense<0.000000e+00> : vector<16x128xf32>
    %2 = tpu.matmul %0, %1, %cst {dimension_numbers = #tpu.dot_dimension_numbers<[1], [0], [0], [1], [0, 0, 1, 1], [], []>} : vector<16x32xbf16>, vector<32x128xbf16>, vector<16x128xf32> -> vector<16x128xf32>
    %c0_3 = arith.constant 0 : index
    %c0_4 = arith.constant 0 : index
    %3 = vector.load %arg3[%c0_3, %c0_4] : memref<1x128xf32, #tpu.memory_space<vmem>>, vector<1x128xf32>
    %4 = vector.broadcast %3 : vector<1x128xf32> to vector<16x128xf32>
    %5 = arith.addf %2, %4 : vector<16x128xf32>
    %cst_5 = arith.constant 0.000000e+00 : f32
    %6 = vector.broadcast %cst_5 : f32 to vector<16x128xf32>
    %7 = arith.maximumf %5, %6 : vector<16x128xf32>
    %8 = arith.truncf %7 : vector<16x128xf32> to vector<16x128xbf16>
    %c0_6 = arith.constant 0 : index
    %c0_7 = arith.constant 0 : index
    %9 = vector.load %arg4[%c0_6, %c0_7] : memref<128x256xbf16, #tpu.memory_space<vmem>>, vector<128x256xbf16>
    %cst_8 = arith.constant dense<0.000000e+00> : vector<16x256xf32>
    %10 = tpu.matmul %8, %9, %cst_8 {dimension_numbers = #tpu.dot_dimension_numbers<[1], [0], [0], [1], [0, 0, 1, 1], [], []>} : vector<16x128xbf16>, vector<128x256xbf16>, vector<16x256xf32> -> vector<16x256xf32>
    %c0_9 = arith.constant 0 : index
    %c0_10 = arith.constant 0 : index
    %11 = vector.load %arg5[%c0_9, %c0_10] : memref<1x256xf32, #tpu.memory_space<vmem>>, vector<1x256xf32>
    %12 = vector.broadcast %11 : vector<1x256xf32> to vector<16x256xf32>
    %13 = arith.addf %10, %12 : vector<16x256xf32>
    %cst_11 = arith.constant 0.000000e+00 : f32
    %14 = vector.broadcast %cst_11 : f32 to vector<16x256xf32>
    %15 = arith.maximumf %13, %14 : vector<16x256xf32>
    %16 = arith.truncf %15 : vector<16x256xf32> to vector<16x256xbf16>
    %c0_12 = arith.constant 0 : index
    %c0_13 = arith.constant 0 : index
    %17 = vector.load %arg6[%c0_12, %c0_13] : memref<256x8xbf16, #tpu.memory_space<vmem>>, vector<256x8xbf16>
    %cst_14 = arith.constant dense<0.000000e+00> : vector<16x8xf32>
    %18 = tpu.matmul %16, %17, %cst_14 {dimension_numbers = #tpu.dot_dimension_numbers<[1], [0], [0], [1], [0, 0, 1, 1], [], []>} : vector<16x256xbf16>, vector<256x8xbf16>, vector<16x8xf32> -> vector<16x8xf32>
    %c0_15 = arith.constant 0 : index
    %c0_16 = arith.constant 0 : index
    %19 = vector.load %arg7[%c0_15, %c0_16] : memref<1x8xf32, #tpu.memory_space<vmem>>, vector<1x8xf32>
    %20 = vector.broadcast %19 : vector<1x8xf32> to vector<16x8xf32>
    %21 = arith.addf %18, %20 : vector<16x8xf32>
    %c0_17 = arith.constant 0 : index
    %c0_18 = arith.constant 0 : index
    %22 = vector.load %arg8[%c0_17, %c0_18] : memref<16x8xf32, #tpu.memory_space<vmem>>, vector<16x8xf32>
    tpu.vector_store %arg8[%c0_17, %c0_18], %21 {strides = array<i32>} : memref<16x8xf32, #tpu.memory_space<vmem>>, vector<16x8xf32>,
    return
  }
  func.func @transform_0(%arg0: i32) -> (i32, i32) {
    %c0_i32 = arith.constant 0 : i32
    %c0_i32_0 = arith.constant 0 : i32
    return %arg0, %c0_i32 : i32, i32
  }
  func.func @transform_1(%arg0: i32) -> (i32, i32) {
    %c0_i32 = arith.constant 0 : i32
    %c0_i32_0 = arith.constant 0 : i32
    %c0_i32_1 = arith.constant 0 : i32
    return %c0_i32, %c0_i32_0 : i32, i32
  }
  func.func @transform_2(%arg0: i32) -> (i32, i32) {
    %c0_i32 = arith.constant 0 : i32
    %c0_i32_0 = arith.constant 0 : i32
    %c0_i32_1 = arith.constant 0 : i32
    return %c0_i32, %c0_i32_0 : i32, i32
  }
  func.func @transform_3(%arg0: i32) -> (i32, i32) {
    %c0_i32 = arith.constant 0 : i32
    %c0_i32_0 = arith.constant 0 : i32
    %c0_i32_1 = arith.constant 0 : i32
    return %c0_i32, %c0_i32_0 : i32, i32
  }
  func.func @transform_4(%arg0: i32) -> (i32, i32) {
    %c0_i32 = arith.constant 0 : i32
    %c0_i32_0 = arith.constant 0 : i32
    %c0_i32_1 = arith.constant 0 : i32
    return %c0_i32, %c0_i32_0 : i32, i32
  }
  func.func @transform_5(%arg0: i32) -> (i32, i32) {
    %c0_i32 = arith.constant 0 : i32
    %c0_i32_0 = arith.constant 0 : i32
    %c0_i32_1 = arith.constant 0 : i32
    return %c0_i32, %c0_i32_0 : i32, i32
  }
  func.func @transform_6(%arg0: i32) -> (i32, i32) {
    %c0_i32 = arith.constant 0 : i32
    %c0_i32_0 = arith.constant 0 : i32
    %c0_i32_1 = arith.constant 0 : i32
    return %c0_i32, %c0_i32_0 : i32, i32
  }
  func.func @transform_7(%arg0: i32) -> (i32, i32) {
    %c0_i32 = arith.constant 0 : i32
    %c0_i32_0 = arith.constant 0 : i32
    return %arg0, %c0_i32 : i32, i32
  }
}

</mosaic_0001>

<bundles_post_ra>
// kernel: tpu_custom_call.1
= control target key start
LH: loop header
LB: loop body
LE: loop exit
PB: predicated region body
PF: predicated region fallthrough
CT: control target
= control target key end

     0   :  { %12 = vsyncpa [#allocation3], 0  ;;  %s827_s0 = inlined_call_operand.hbm [shape: bf16[16,32], index: 0, kind: input, shape index: {}]   ;;  %s828_s1 = inlined_call_operand.vmem [shape: bf16[32,128], index: 1, kind: input, shape index: {}]   ;;  %s829_s2 = inlined_call_operand.hbm [shape: f32[1,128], index: 2, kind: input, shape index: {}]   ;;  %s830_s3 = inlined_call_operand.vmem [shape: bf16[128,256], index: 3, kind: input, shape index: {}]   ;;  %s831_s4 = inlined_call_operand.vmem [shape: f32[1,256], index: 4, kind: input, shape index: {}]   ;;  %s832_s5 = inlined_call_operand.vmem [shape: bf16[256,8], index: 5, kind: input, shape index: {}]   ;;  %s833_s6 = inlined_call_operand.vmem [shape: f32[1,8], index: 6, kind: input, shape index: {}]   ;;  %s834_s7 = inlined_call_operand.vmem [shape: f32[16,8], index: 7, kind: output, shape index: {}]  }
   0x1   :  { %13 = vsyncpa [#allocation5], 0  ;;  %s642_s24 = smov [#allocation2]   ;;  %s594_s28 = scalar_lea.hbm %s827_s0, 128 }
   0x2   :  { %s19_s25 = sshll.u32 %s642_s24, 4  ;;  %p595_p0 = scmp.ne.s32.totalorder %s827_s0, %s594_s28  ;;  %s20_s25 = int_to_ptr.vmem [resolvable:$true] %s19_s25 }
   0x3   :  { %p598_p1 = scmp.lt.u32.totalorder %s594_s28, %s827_s0 }
   0x5   :  { %p600_p2 = pnand %p598_p1, %p595_p0 }
   0x7   :  { %603 = shalt.err (!%p600_p2)
}
   0x8   :  { %s604_s10 = scalar_lea.vmem %s20_s25, 128  ;;  %p609_p4 = scmp.lt.s32.totalorder %s20_s25, %s20_s25 }
   0x9   :  { %p605_p3 = scmp.ne.s32.totalorder %s20_s25, %s604_s10  ;;  %p610_p5 = scmp.lt.s32.totalorder %s604_s10, %s604_s10 }
   0xb   :  { %p611_p6 = por %p610_p5, %p609_p4 }
   0xd   :  { %p612_p7 = pnand %p611_p6, %p605_p3 }
   0xf   :  { %615 = shalt.err (!%p612_p7)
}
  0x10   :  { %s643_s11 = smov 64   ;;  %s644_s12 = smov 4  }
  0x11   :  { %25 = dma.hbm_to_vmem [thread:$0]  %s827_s0, 128, %s20_s25, [#allocation3], %s643_s11, %s643_s11, %s644_s12  }
  0x12   :  { %s645_s15 = smov [#allocation4]   ;;  %s616_s19 = scalar_lea.hbm %s829_s2, 16 }
  0x13   :  { %s34_s16 = sshll.u32 %s645_s15, 4  ;;  %p617_p8 = scmp.ne.s32.totalorder %s829_s2, %s616_s19  ;;  %s35_s16 = int_to_ptr.vmem [resolvable:$true] %s34_s16 }
  0x14   :  { %p620_p9 = scmp.lt.u32.totalorder %s616_s19, %s829_s2 }
  0x16   :  { %p622_p10 = pnand %p620_p9, %p617_p8 }
  0x18   :  { %625 = shalt.err (!%p622_p10)
}
  0x19   :  { %s626_s24 = scalar_lea.vmem %s35_s16, 16  ;;  %s630_s0 = scalar_lea.vmem %s35_s16, 32 }
  0x1a   :  { %p627_p11 = scmp.ne.s32.totalorder %s35_s16, %s626_s24  ;;  %p631_p12 = scmp.lt.s32.totalorder %s35_s16, %s35_s16 }
  0x1b   :  { %p632_p13 = scmp.lt.s32.totalorder %s630_s0, %s626_s24 }
  0x1d   :  { %p633_p0 = por %p632_p13, %p631_p12 }
  0x1f   :  { %p634_p1 = pnand %p633_p0, %p627_p11 }
  0x21   :  { %637 = shalt.err (!%p634_p1)
}
  0x22   :  { %37 = dma.hbm_to_vmem [thread:$0]  %s829_s2, 16, %s35_s16, [#allocation5]  }
  0x23   :  { %638 = dma.done.wait [#allocation3], 128  }
  0x24   :  { %639 = vsyncadd [#allocation3], 4294967168 }
  0x25   :  { %640 = dma.done.wait [#allocation5], 16  }
  0x26   :  { %641 = vsyncadd [#allocation5], 4294967280  ;;  %v646_v0 = vmov 0.0   ;;  %vm647_vm0 = vmmov 0   ;;  %v551_v1 = vld [vmem:[%s828_s1] sm:$0xff]   ;;  %v552_v2 = vld [vmem:[%s828_s1 + $0x8] sm:$0xff]   ;;  %v149_v47 = vlaneseq }
  0x27   :  { %536 = vmatprep.subr.bf16.mxu0 %v646_v0  ;;  %540 = vmatprep.mubr.msk.bf16.mxu0 %vm647_vm0, %v646_v0  ;;  %v554_v3 = vld [vmem:[%s830_s3 + $0x4] ss:$8 sps:$4 sm:$0xff]   ;;  %v556_v4 = vld [vmem:[%s830_s3] ss:$8 sps:$4 sm:$0xff]   ;;  %v557_v6 = vld [vmem:[%s830_s3 + $0x14] ss:$8 sps:$4 sm:$0xff]  }
  0x28   :  { %537 = vmatpush3.bf16.msra.mxu0 %v551_v1  ;;  %v553_v5 = vld [vmem:[#allocation2] sm:$0xff]   ;;  %239 = vmatprep.subr.bf16.mxu1 %v554_v3  ;;  %vm83_vm1 = vcmask 261120   ;;  %v559_v7 = vld [vmem:[%s830_s3 + $0x10] ss:$8 sps:$4 sm:$0xff]   ;;  %v563_v10 = vld [vmem:[%s830_s3 + $0x34] ss:$8 sps:$4 sm:$0xff]  }
  0x29   :  { %538 = vmatprep.subr.bf16.mxu0 %v646_v0  ;;  %240 = vmatpush1.bf16.msra.mxu1 %v556_v4  ;;  %v560_v8 = vld [vmem:[%s830_s3 + $0x24] ss:$8 sps:$4 sm:$0xff]   ;;  %v562_v9 = vld [vmem:[%s830_s3 + $0x20] ss:$8 sps:$4 sm:$0xff]   ;;  %v565_v11 = vld [vmem:[%s830_s3 + $0x30] ss:$8 sps:$4 sm:$0xff]  }
  0x2a   :  { %241 = vmatprep.subr.bf16.mxu1 %v557_v6  ;;  %v566_v12 = vld [vmem:[%s830_s3 + $0x44] ss:$8 sps:$4 sm:$0xff]   ;;  %v568_v13 = vld [vmem:[%s830_s3 + $0x40] ss:$8 sps:$4 sm:$0xff]   ;;  %v569_v14 = vld [vmem:[%s830_s3 + $0x54] ss:$8 sps:$4 sm:$0xff]  }
  0x2b   :  { %v571_v15 = vld [vmem:[%s830_s3 + $0x50] ss:$8 sps:$4 sm:$0xff]   ;;  %v572_v16 = vld [vmem:[%s830_s3 + $0x64] ss:$8 sps:$4 sm:$0xff]   ;;  %v574_v17 = vld [vmem:[%s830_s3 + $0x60] ss:$8 sps:$4 sm:$0xff]  }
  0x2c   :  { %539 = vmatpush3.bf16.msra.mxu0 %v552_v2  ;;  %v575_v18 = vld [vmem:[%s830_s3 + $0x74] ss:$8 sps:$4 sm:$0xff]   ;;  %v577_v19 = vld [vmem:[%s830_s3 + $0x70] ss:$8 sps:$4 sm:$0xff]   ;;  %v648_v20 = vmov 0   ;;  %v578_v21 = vld [vmem:[%s832_s5 + $0x40] sm:$0xff]  }
  0x2d   :  { %242 = vmatpush1.bf16.msra.mxu1 %v559_v7  ;;  %271 = vmatprep.mubr.bf16.mxu1 %v648_v20  ;;  %v579_v22 = vld [vmem:[%s832_s5] sm:$0xff]   ;;  %v580_v23 = vld [vmem:[%s832_s5 + $0x48] sm:$0xff]   ;;  %v582_v25 = vld [vmem:[%s832_s5 + $0x50] sm:$0xff]   ;;  %v150_v48 = vshrl.u32 %v149_v47, 7  ;;  %vm464_vm2 = vcmask 64512  }
  0x2e   :  { %243 = vmatprep.subr.bf16.mxu1 %v560_v8  ;;  %514 = vmatprep.subr.bf16.mxu0 %v578_v21  ;;  %v581_v24 = vld [vmem:[%s832_s5 + $0x8] sm:$0xff]   ;;  %v583_v26 = vld [vmem:[%s832_s5 + $0x10] sm:$0xff]   ;;  %v584_v27 = vld [vmem:[%s832_s5 + $0x58] sm:$0xff]  }
  0x2f   :  { %541 = vmatmul.mubr.msk.bf16.vlgmr.msra.gmra.mrb[0].mxu0 %vm83_vm1, %v553_v5  ;;  %v585_v28 = vld [vmem:[%s832_s5 + $0x18] sm:$0xff]   ;;  %v586_v29 = vld [vmem:[%s832_s5 + $0x60] sm:$0xff]   ;;  %v588_v31 = vld [vmem:[%s832_s5 + $0x68] sm:$0xff]   ;;  %v151_v49 = vsub.s32 0, %v150_v48  ;;  %v155_v51 = vsub.s32 1, %v150_v48 }
  0x30   :  { %515 = vmatpush3.bf16.msra.mxu0 %v579_v22  ;;  %v587_v30 = vld [vmem:[%s832_s5 + $0x20] sm:$0xff]   ;;  %v473_v32 = vld [vmem:[#allocation4] ss:$0 sm:$0xff]  ;;  %v590_v43 = vld [vmem:[%s832_s5 + $0x70] sm:$0xff]  }
  0x31   :  { %244 = vmatpush1.bf16.msra.mxu1 %v562_v9  ;;  %516 = vmatprep.subr.bf16.mxu0 %v580_v23  ;;  %v589_v42 = vld [vmem:[%s832_s5 + $0x28] sm:$0xff]   ;;  %v591_v44 = vld [vmem:[%s832_s5 + $0x30] sm:$0xff]   ;;  %v592_v45 = vld [vmem:[%s832_s5 + $0x78] sm:$0xff]  }
  0x32   :  { %245 = vmatprep.subr.bf16.mxu1 %v563_v10  ;;  %v593_v46 = vld [vmem:[%s832_s5 + $0x38] sm:$0xff]   ;;  %v147_v50 = vld [vmem:[%s831_s4] sm:$0x3] }
  0x33   :  { %v152_v52 = vrot.slane %v147_v50, %v151_v49  ;;  %v156_v53 = vrot.slane %v147_v50, %v155_v51  ;;  %v494_v5 = vld [vmem:[%s833_s6] ss:$0 sm:$0xff] }
  0x34   :  { %517 = vmatpush3.bf16.msra.mxu0 %v581_v24 }
  0x35   :  { %246 = vmatpush1.bf16.msra.mxu1 %v565_v11  ;;  %518 = vmatprep.subr.bf16.mxu0 %v582_v25 }
  0x36   :  { %247 = vmatprep.subr.bf16.mxu1 %v566_v12 }
  0x38   :  { %519 = vmatpush3.bf16.msra.mxu0 %v583_v26 }
  0x39   :  { %248 = vmatpush1.bf16.msra.mxu1 %v568_v13  ;;  %520 = vmatprep.subr.bf16.mxu0 %v584_v27 }
  0x3a   :  { %249 = vmatprep.subr.bf16.mxu1 %v569_v14 }
  0x3c   :  { %521 = vmatpush3.bf16.msra.mxu0 %v585_v28 }
  0x3d   :  { %250 = vmatpush1.bf16.msra.mxu1 %v571_v15  ;;  %522 = vmatprep.subr.bf16.mxu0 %v586_v29 }
  0x3e   :  { %251 = vmatprep.subr.bf16.mxu1 %v572_v16 }
  0x40   :  { %523 = vmatpush3.bf16.msra.mxu0 %v587_v30 }
  0x41   :  { %252 = vmatpush1.bf16.msra.mxu1 %v574_v17  ;;  %524 = vmatprep.subr.bf16.mxu0 %v588_v31 }
  0x42   :  { %253 = vmatprep.subr.bf16.mxu1 %v575_v18 }
  0x44   :  { %525 = vmatpush3.bf16.msra.mxu0 %v589_v42 }
  0x45   :  { %254 = vmatpush1.bf16.msra.mxu1 %v577_v19  ;;  %526 = vmatprep.subr.bf16.mxu0 %v590_v43 }
  0x48   :  { %527 = vmatpush3.bf16.msra.mxu0 %v591_v44 }
  0x49   :  { %528 = vmatprep.subr.bf16.mxu0 %v592_v45 }
  0x4c   :  { %529 = vmatpush3.bf16.msra.mxu0 %v593_v46 }
 0x102   :  { %v121_v33 = vpop.f32.mrb[0].mxu0 }
 0x103   :  { %v122_v34 = vadd.f32 %v473_v32, %v121_v33  ;;  %v542_v35 = vpop.f32.mrb[1].mxu0 }
 0x104   :  { %v124_v36 = vpop.f32.mrb[2].mxu0 }
 0x105   :  { %v125_v37 = vadd.f32 %v473_v32, %v124_v36  ;;  %v543_v38 = vpop.f32.mrb[3].mxu0  ;;  %v128_v39 = vmax.f32 %v122_v34, 0.0 }
 0x107   :  { %v129_v40 = vmax.f32 %v125_v37, 0.0 }
 0x109   :  { %v130_v41 = vpack.c.bf16 %v129_v40, %v128_v39 }
 0x10b   :  { %272 = vmatmul.mubr.bf16.vlgmr.msra.gmra.mrb[0].mxu1 %v130_v41 }
 0x1de   :  { %v273_v54 = vpop.f32.mrb[0].mxu1 }
 0x1df   :  { %v274_v55 = vadd.f32 %v273_v54, %v152_v52  ;;  %v275_v56 = vpop.f32.mrb[1].mxu1 }
 0x1e0   :  { %v276_v57 = vadd.f32 %v275_v56, %v156_v53  ;;  %v277_v58 = vpop.f32.mrb[2].mxu1 }
 0x1e1   :  { %v278_v59 = vadd.f32 %v277_v58, %v152_v52  ;;  %v279_v60 = vpop.f32.mrb[3].mxu1  ;;  %v282_v62 = vmax.f32 %v274_v55, 0.0 }
 0x1e2   :  { %v280_v61 = vadd.f32 %v279_v60, %v156_v53  ;;  %v283_v0 = vmax.f32 %v276_v57, 0.0 }
 0x1e3   :  { %v284_v63 = vmax.f32 %v278_v59, 0.0 }
 0x1e4   :  { %v285_v1 = vmax.f32 %v280_v61, 0.0 }
 0x1e5   :  { %v286_v2 = vpack.c.bf16 %v284_v63, %v282_v62 }
 0x1e6   :  { %v287_v3 = vpack.c.bf16 %v285_v1, %v283_v0 }
 0x1e8   :  { %455 = vmatprep.mubr.bf16.mxu0 %v287_v3 }
 0x1e9   :  { %456 = vmatmul.mubr.bf16.vlgmr.msra.gmra.mrb[4].mxu0 %v286_v2 }
 0x2bc   :  { %v530_v4 = vpop.f32.mrb[4].mxu0 }
 0x2bd   :  { %v531_v6 = vpop.f32.mrb[5].mxu0 }
 0x2be   :  { %v532_v7 = vadd.f32 %v531_v6, %v530_v4  ;;  %v533_v8 = vpop.f32.mrb[6].mxu0 }
 0x2bf   :  { %v534_v9 = vpop.f32.mrb[7].mxu0 }
 0x2c0   :  { %v458_v10 = vadd.f32 %v532_v7, %v494_v5  ;;  %v535_v11 = vadd.f32 %v534_v9, %v533_v8 }
 0x2c2   :  { %465 = vst.msk [vmem:[%s834_s7] sm:$0xff] %vm464_vm2, %v458_v10  ;;  %v461_v12 = vadd.f32 %v535_v11, %v494_v5 }
 0x2c4   :  { %466 = vst.msk [vmem:[%s834_s7 + $0x8] sm:$0xff] %vm464_vm2, %v461_v12 }
 0x2c5   :  { %471 = vsyncpa [#allocation3], 1 }
 0x2c6   :  { %472 = vsyncpa [#allocation5], 1 }

</bundles_post_ra>
